<compile_context>
chip_gen: v7x
topology: tpu7x:2x2x1
jax: 0.10.0
libtpu: 0.0.40
codegen_flags: <defaults>
</compile_context>

<pallas_src>
import functools

import jax
import jax.numpy as jnp
from jax import lax
from jax.experimental import pallas as pl
from jax.experimental.pallas import tpu as pltpu

_INV_SQRT2 = 0.7071067811865476  # 1/sqrt(2)


def _round_up(x, n):
    return ((x + n - 1) // n) * n


def _pad2(a, rows, cols):
    pr, pc = rows - a.shape[0], cols - a.shape[1]
    if pr == 0 and pc == 0:
        return a
    return jnp.pad(a, ((0, pr), (0, pc)))


def _mlp_step(x, w1, b1, w2, acc_ref, approximate):
    # fc1 partial: (tm, d_in_p) @ (d_in_p, th) -> (tm, th), f32 MXU accumulate
    h = jnp.dot(x, w1, preferred_element_type=jnp.float32)
    h = h + b1.astype(jnp.float32)
    if approximate:
        # tanh-approx GELU runs on the EUP (own bundle slot); opt-in only.
        h = jax.nn.gelu(h, approximate=True)
    else:
        # Exact GELU (matches torch.nn.GELU default): 0.5*x*(1+erf(x/sqrt(2)))
        h = 0.5 * h * (1.0 + lax.erf(h * _INV_SQRT2))
    # ffn_ln is nn.Identity() (subln=False); Dropout(p=0.0) is identity.
    # fc2 partial-sum: accumulate h_j @ W2[hj, :] in f32
    acc_ref[...] += jnp.dot(h.astype(w2.dtype), w2,
                            preferred_element_type=jnp.float32)


def _mlp_kernel_streamed(x_ref, w1_ref, b1_ref, w2_ref, b2_ref, o_ref,
                         acc_ref, *, approximate):
    # Weights arrive as (d_in_p, th) / (th, d_out_p) tiles streamed by
    # BlockSpec along the hidden (reduction) axis.
    j = pl.program_id(1)

    @pl.when(j == 0)
    def _init():
        acc_ref[...] = jnp.zeros_like(acc_ref)

    _mlp_step(x_ref[...], w1_ref[...], b1_ref[...], w2_ref[...], acc_ref,
              approximate)

    @pl.when(j == pl.num_programs(1) - 1)
    def _finalize():
        o_ref[...] = (acc_ref[...]
                      + b2_ref[...].astype(jnp.float32)).astype(o_ref.dtype)


def _mlp_kernel_resident(x_ref, w1_ref, b1_ref, w2_ref, b2_ref, o_ref,
                         acc_ref, *, th, approximate):
    # Full padded W1/W2 are VMEM-resident (constant index_map => fetched
    # once); slice the j-th hidden chunk in-kernel at a 128-aligned offset.
    j = pl.program_id(1)

    @pl.when(j == 0)
    def _init():
        acc_ref[...] = jnp.zeros_like(acc_ref)

    off = pl.multiple_of(j * th, 128)
    _mlp_step(x_ref[...],
              w1_ref[:, pl.ds(off, th)],
              b1_ref[...],
              w2_ref[pl.ds(off, th), :],
              acc_ref, approximate)

    @pl.when(j == pl.num_programs(1) - 1)
    def _finalize():
        o_ref[...] = (acc_ref[...]
                      + b2_ref[...].astype(jnp.float32)).astype(o_ref.dtype)


def mlp_pallas(x, w1, b1, w2, b2, *, tm=512, th=1024,
               compute_dtype=jnp.bfloat16, resident_weights=None,
               approximate_gelu=False):
    """EVA-CLIP Mlp forward.

    x:  (..., in_features)
    w1: (in_features, hidden)   -- transpose of PyTorch fc1.weight
    b1: (hidden,)
    w2: (hidden, out_features)  -- transpose of PyTorch fc2.weight
    b2: (out_features,)

    compute_dtype: dtype of the MXU operands (default bf16 for full MXU
        throughput on v5e/v6e/v7x). Accumulation, bias add and GELU are f32.
        bf16 operands deviate from the f32 reference at the ~1e-2 level;
        pass compute_dtype=None for exact f32 parity.
    resident_weights: None = auto (pin W1/W2 in VMEM if they fit, otherwise
        stream weight tiles); True/False forces the mode.
    Returns (..., out_features) in x's original dtype.
    """
    orig_shape = x.shape
    d_in = orig_shape[-1]
    hidden = w1.shape[1]
    d_out = w2.shape[1]
    assert w1.shape[0] == d_in and w2.shape[0] == hidden
    assert b1.shape[-1] == hidden and b2.shape[-1] == d_out
    out_dtype = x.dtype

    if compute_dtype is not None:
        x = x.astype(compute_dtype)
        w1 = w1.astype(compute_dtype)
        w2 = w2.astype(compute_dtype)

    x2 = x.reshape(-1, d_in)
    m = x2.shape[0]
    itemsize = jnp.dtype(x2.dtype).itemsize
    out_itemsize = jnp.dtype(out_dtype).itemsize

    # ---- Padded feature dims (lane-dense: multiples of 128) ---------------
    d_in_p = _round_up(d_in, 128)
    d_out_p = _round_up(d_out, 128)
    hid_p = _round_up(hidden, 128)

    # ---- Hidden tile: multiple of 128 that divides the padded hidden dim --
    th = min(_round_up(th, 128), hid_p)
    while hid_p % th != 0:
        th -= 128

    # ---- Row tile: large & 8-aligned; guarantee >=2 M tiles when there are
    #      enough rows so the "parallel" axis shards across v7x's two TCs. --
    m8 = _round_up(max(m, 1), 8)
    if m8 >= 512:
        tm = min(tm, _round_up((m8 + 1) // 2, 256))
    else:
        tm = min(tm, m8)
    m_p = _round_up(m, tm)
    m_tiles = m_p // tm
    h_tiles = hid_p // th

    # ---- VMEM budget & weight-residency decision ---------------------------
    try:
        vmem_cap = int(pltpu.get_tpu_info().vmem_capacity_bytes)
    except Exception:
        vmem_cap = 64 * 1024 * 1024  # conservative: v7x per-TensorCore VMEM

    common = (2 * tm * d_in_p * itemsize          # x tile (double-buffered)
              + 2 * (th + d_out_p) * 4            # bias tiles (f32)
              + 2 * tm * d_out_p * out_itemsize   # output tile
              + tm * d_out_p * 4                  # f32 accumulator
              + tm * th * 4)                      # fc1/GELU intermediate
    streamed_est = common + 2 * (d_in_p * th + th * d_out_p) * itemsize
    resident_est = common + 2 * (d_in_p + d_out_p) * hid_p * itemsize
    if resident_weights is None:
        resident = resident_est <= int(vmem_cap * 0.80)
    else:
        resident = bool(resident_weights)
    vmem_est = resident_est if resident else streamed_est
    # Cap at 7/8 of physical VMEM: never request the full 64 MiB on v7x.
    vmem_limit = min(max(int(vmem_est * 1.4), 8 * 1024 * 1024),
                     (vmem_cap // 8) * 7)

    # ---- Zero padding keeps the math exact: padded input features multiply
    # zero weight rows, padded hidden units have GELU(0)*0 contributions, and
    # padded output columns are sliced off.
    # TODO(synk): for steady-state inference, pre-pad/cast the weights once at
    # load time; the pads below are skipped when already the right shape.
    x_p = _pad2(x2, m_p, d_in_p)
    w1_p = _pad2(w1, d_in_p, hid_p)
    b1_p = _pad2(b1.reshape(1, hidden).astype(jnp.float32), 1, hid_p)
    w2_p = _pad2(w2, hid_p, d_out_p)
    b2_p = _pad2(b2.reshape(1, d_out).astype(jnp.float32), 1, d_out_p)

    if resident:
        kernel = functools.partial(_mlp_kernel_resident, th=th,
                                   approximate=approximate_gelu)
        w1_spec = pl.BlockSpec((d_in_p, hid_p), lambda i, j: (0, 0))
        w2_spec = pl.BlockSpec((hid_p, d_out_p), lambda i, j: (0, 0))
    else:
        kernel = functools.partial(_mlp_kernel_streamed,
                                   approximate=approximate_gelu)
        w1_spec = pl.BlockSpec((d_in_p, th), lambda i, j: (0, j))
        w2_spec = pl.BlockSpec((th, d_out_p), lambda i, j: (j, 0))

    w_bytes = (d_in_p + d_out_p) * hid_p * itemsize
    cost = pl.CostEstimate(
        flops=2 * m_p * (d_in_p + d_out_p) * hid_p,
        transcendentals=m_p * hid_p,
        bytes_accessed=(m_p * d_in_p * itemsize
                        + (w_bytes if resident else w_bytes * m_tiles)
                        + (hid_p + d_out_p) * 4 * m_tiles
                        + m_p * d_out_p * out_itemsize),
    )

    out = pl.pallas_call(
        kernel,
        out_shape=jax.ShapeDtypeStruct((m_p, d_out_p), out_dtype),
        grid_spec=pltpu.PrefetchScalarGridSpec(
            num_scalar_prefetch=0,
            grid=(m_tiles, h_tiles),
            in_specs=[
                pl.BlockSpec((tm, d_in_p), lambda i, j: (i, 0)),
                w1_spec,
                pl.BlockSpec((1, th), lambda i, j: (0, j)),
                w2_spec,
                pl.BlockSpec((1, d_out_p), lambda i, j: (0, 0)),
            ],
            out_specs=pl.BlockSpec((tm, d_out_p), lambda i, j: (i, 0)),
            scratch_shapes=[pltpu.VMEM((tm, d_out_p), jnp.float32)],
        ),
        compiler_params=pltpu.CompilerParams(
            dimension_semantics=("parallel", "arbitrary"),
            vmem_limit_bytes=vmem_limit,
        ),
        cost_estimate=cost,
    )(x_p, w1_p, b1_p, w2_p, b2_p)

    out = out[:m, :d_out]
    return out.reshape(*orig_shape[:-1], d_out)


def _reference_mlp(x, w1, b1, w2, b2):
    h = x @ w1 + b1
    h = 0.5 * h * (1.0 + lax.erf(h * _INV_SQRT2))
    return h @ w2 + b2


if __name__ == "__main__":
    # Small shapes consistent with Mlp(in_features=32, hidden_features=256)
    batch, seq, d_in, hidden = 2, 8, 32, 256
    d_out = d_in  # out_features defaults to in_features

    key = jax.random.PRNGKey(0)
    kx, k1, kb1, k2, kb2 = jax.random.split(key, 5)

    x = jax.random.normal(kx, (batch, seq, d_in), dtype=jnp.float32)
    # PyTorch fc1.weight is (hidden, in); we store the transpose (in, hidden)
    # so the kernel computes x @ W.
    w1 = jax.random.normal(k1, (d_in, hidden), dtype=jnp.float32) * 0.05
    b1 = jax.random.normal(kb1, (hidden,), dtype=jnp.float32) * 0.05
    w2 = jax.random.normal(k2, (hidden, d_out), dtype=jnp.float32) * 0.05
    b2 = jax.random.normal(kb2, (d_out,), dtype=jnp.float32) * 0.05

    ref = _reference_mlp(x.reshape(-1, d_in), w1, b1, w2, b2).reshape(
        batch, seq, d_out)

    # Default fast path: bf16 MXU operands (f32 accumulation), weights
    # VMEM-resident, two hidden tiles (th=128) exercising the reduction axis.
    out_fast = jax.block_until_ready(mlp_pallas(x, w1, b1, w2, b2, th=128))
    assert out_fast.shape == (batch, seq, d_out)
    assert jnp.allclose(out_fast, ref, atol=3e-2, rtol=3e-2), (
        float(jnp.max(jnp.abs(out_fast - ref))))

    # Exact-parity path: f32 operands + streamed-weight BlockSpecs (exercises
    # the second kernel variant).
    out_exact = jax.block_until_ready(
        mlp_pallas(x, w1, b1, w2, b2, th=128, compute_dtype=None,
                   resident_weights=False))
    assert jnp.allclose(out_exact, ref, atol=1e-4, rtol=1e-4), (
        float(jnp.max(jnp.abs(out_exact - ref))))

    print("KERNEL_OK")
</pallas_src>

<mosaic_0001>
module attributes {stable_mosaic.version = 11 : i64} {
  func.func @_mlp_kernel_resident(%arg0: i32, %arg1: i32, %arg2: memref<16x128xbf16, #tpu.memory_space<vmem>>, %arg3: memref<128x256xbf16, #tpu.memory_space<vmem>>, %arg4: memref<1x128xf32, #tpu.memory_space<vmem>>, %arg5: memref<256x128xbf16, #tpu.memory_space<vmem>>, %arg6: memref<1x128xf32, #tpu.memory_space<vmem>>, %arg7: memref<16x128xf32, #tpu.memory_space<vmem>>, %arg8: memref<16x128xf32, #tpu.memory_space<vmem>>) attributes {dimension_semantics = [#tpu.dimension_semantics<parallel>, #tpu.dimension_semantics<arbitrary>], iteration_bounds = array<i64: 1, 2>, scalar_prefetch = 0 : i64, scratch_operands = 1 : i64, tpu.core_type = #tpu.core_type<tc>, window_params = [{transform_indices = @transform_0, window_bounds = array<i64: 16, 128>}, {pipeline_mode = #tpu.pipeline_mode<synchronous>, transform_indices = @transform_1, window_bounds = array<i64: 128, 256>}, {transform_indices = @transform_2, window_bounds = array<i64: 1, 128>}, {pipeline_mode = #tpu.pipeline_mode<synchronous>, transform_indices = @transform_3, window_bounds = array<i64: 256, 128>}, {pipeline_mode = #tpu.pipeline_mode<synchronous>, transform_indices = @transform_4, window_bounds = array<i64: 1, 128>}, {transform_indices = @transform_5, window_bounds = array<i64: 16, 128>}]} {
    %c0_i32 = arith.constant 0 : i32
    %0 = arith.cmpi eq, %arg1, %c0_i32 : i32
    %1 = arith.extui %0 : i1 to i32
    %c0_i32_0 = arith.constant 0 : i32
    %2 = arith.cmpi ne, %1, %c0_i32_0 : i32
    scf.if %2 {
      %cst_15 = arith.constant 0.000000e+00 : f32
      %30 = vector.broadcast %cst_15 : f32 to vector<16x128xf32>
      %c0_16 = arith.constant 0 : index
      %c0_17 = arith.constant 0 : index
      %31 = vector.load %arg8[%c0_16, %c0_17] : memref<16x128xf32, #tpu.memory_space<vmem>>, vector<16x128xf32>
      tpu.vector_store %arg8[%c0_16, %c0_17], %30 {strides = array<i32>} : memref<16x128xf32, #tpu.memory_space<vmem>>, vector<16x128xf32>,
    } else {
    }
    %c128_i32 = arith.constant 128 : i32
    %3 = arith.muli %arg1, %c128_i32 : i32
    %4 = tpu.assume_multiple %3, 128 : i32
    %c0 = arith.constant 0 : index
    %c0_1 = arith.constant 0 : index
    %5 = vector.load %arg2[%c0, %c0_1] : memref<16x128xbf16, #tpu.memory_space<vmem>>, vector<16x128xbf16>
    %c0_2 = arith.constant 0 : index
    %6 = arith.index_cast %4 : i32 to index
    %7 = vector.load %arg3[%c0_2, %6] : memref<128x256xbf16, #tpu.memory_space<vmem>>, vector<128x128xbf16>
    %c0_3 = arith.constant 0 : index
    %c0_4 = arith.constant 0 : index
    %8 = vector.load %arg4[%c0_3, %c0_4] : memref<1x128xf32, #tpu.memory_space<vmem>>, vector<1x128xf32>
    %9 = arith.index_cast %4 : i32 to index
    %c0_5 = arith.constant 0 : index
    %10 = vector.load %arg5[%9, %c0_5] : memref<256x128xbf16, #tpu.memory_space<vmem>>, vector<128x128xbf16>
    %cst = arith.constant dense<0.000000e+00> : vector<16x128xf32>
    %11 = tpu.matmul %5, %7, %cst {dimension_numbers = #tpu.dot_dimension_numbers<[1], [0], [0], [1], [0, 0, 1, 1], [], []>} : vector<16x128xbf16>, vector<128x128xbf16>, vector<16x128xf32> -> vector<16x128xf32>
    %12 = vector.broadcast %8 : vector<1x128xf32> to vector<16x128xf32>
    %13 = arith.addf %11, %12 : vector<16x128xf32>
    %cst_6 = arith.constant 5.000000e-01 : f32
    %14 = vector.broadcast %cst_6 : f32 to vector<16x128xf32>
    %15 = arith.mulf %14, %13 : vector<16x128xf32>
    %cst_7 = arith.constant 0.707106769 : f32
    %16 = vector.broadcast %cst_7 : f32 to vector<16x128xf32>
    %17 = arith.mulf %13, %16 : vector<16x128xf32>
    %18 = math.erf %17 : vector<16x128xf32>
    %cst_8 = arith.constant 1.000000e+00 : f32
    %19 = vector.broadcast %cst_8 : f32 to vector<16x128xf32>
    %20 = arith.addf %19, %18 : vector<16x128xf32>
    %21 = arith.mulf %15, %20 : vector<16x128xf32>
    %c0_9 = arith.constant 0 : index
    %c0_10 = arith.constant 0 : index
    %22 = vector.load %arg8[%c0_9, %c0_10] : memref<16x128xf32, #tpu.memory_space<vmem>>, vector<16x128xf32>
    %23 = arith.truncf %21 : vector<16x128xf32> to vector<16x128xbf16>
    %cst_11 = arith.constant dense<0.000000e+00> : vector<16x128xf32>
    %24 = tpu.matmul %23, %10, %cst_11 {dimension_numbers = #tpu.dot_dimension_numbers<[1], [0], [0], [1], [0, 0, 1, 1], [], []>} : vector<16x128xbf16>, vector<128x128xbf16>, vector<16x128xf32> -> vector<16x128xf32>
    %25 = arith.addf %22, %24 : vector<16x128xf32>
    %c0_12 = arith.constant 0 : index
    %c0_13 = arith.constant 0 : index
    %26 = vector.load %arg8[%c0_12, %c0_13] : memref<16x128xf32, #tpu.memory_space<vmem>>, vector<16x128xf32>
    tpu.vector_store %arg8[%c0_12, %c0_13], %25 {strides = array<i32>} : memref<16x128xf32, #tpu.memory_space<vmem>>, vector<16x128xf32>,
    %c1_i32 = arith.constant 1 : i32
    %27 = arith.cmpi eq, %arg1, %c1_i32 : i32
    %28 = arith.extui %27 : i1 to i32
    %c0_i32_14 = arith.constant 0 : i32
    %29 = arith.cmpi ne, %28, %c0_i32_14 : i32
    scf.if %29 {
      %c0_15 = arith.constant 0 : index
      %c0_16 = arith.constant 0 : index
      %30 = vector.load %arg8[%c0_15, %c0_16] : memref<16x128xf32, #tpu.memory_space<vmem>>, vector<16x128xf32>
      %c0_17 = arith.constant 0 : index
      %c0_18 = arith.constant 0 : index
      %31 = vector.load %arg6[%c0_17, %c0_18] : memref<1x128xf32, #tpu.memory_space<vmem>>, vector<1x128xf32>
      %32 = vector.broadcast %31 : vector<1x128xf32> to vector<16x128xf32>
      %33 = arith.addf %30, %32 : vector<16x128xf32>
      %c0_19 = arith.constant 0 : index
      %c0_20 = arith.constant 0 : index
      %34 = vector.load %arg7[%c0_19, %c0_20] : memref<16x128xf32, #tpu.memory_space<vmem>>, vector<16x128xf32>
      tpu.vector_store %arg7[%c0_19, %c0_20], %33 {strides = array<i32>} : memref<16x128xf32, #tpu.memory_space<vmem>>, vector<16x128xf32>,
    } else {
    }
    return
  }
  func.func @transform_0(%arg0: i32, %arg1: i32) -> (i32, i32) {
    %c0_i32 = arith.constant 0 : i32
    %c0_i32_0 = arith.constant 0 : i32
    return %arg0, %c0_i32 : i32, i32
  }
  func.func @transform_1(%arg0: i32, %arg1: i32) -> (i32, i32) {
    %c0_i32 = arith.constant 0 : i32
    %c0_i32_0 = arith.constant 0 : i32
    %c0_i32_1 = arith.constant 0 : i32
    return %c0_i32, %c0_i32_0 : i32, i32
  }
  func.func @transform_2(%arg0: i32, %arg1: i32) -> (i32, i32) {
    %c0_i32 = arith.constant 0 : i32
    %c0_i32_0 = arith.constant 0 : i32
    return %c0_i32, %arg1 : i32, i32
  }
  func.func @transform_3(%arg0: i32, %arg1: i32) -> (i32, i32) {
    %c0_i32 = arith.constant 0 : i32
    %c0_i32_0 = arith.constant 0 : i32
    %c0_i32_1 = arith.constant 0 : i32
    return %c0_i32, %c0_i32_0 : i32, i32
  }
  func.func @transform_4(%arg0: i32, %arg1: i32) -> (i32, i32) {
    %c0_i32 = arith.constant 0 : i32
    %c0_i32_0 = arith.constant 0 : i32
    %c0_i32_1 = arith.constant 0 : i32
    return %c0_i32, %c0_i32_0 : i32, i32
  }
  func.func @transform_5(%arg0: i32, %arg1: i32) -> (i32, i32) {
    %c0_i32 = arith.constant 0 : i32
    %c0_i32_0 = arith.constant 0 : i32
    return %arg0, %c0_i32 : i32, i32
  }
}

</mosaic_0001>

<bundles_post_ra>
// kernel: tpu_custom_call.1
= control target key start
LH: loop header
LB: loop body
LE: loop exit
PB: predicated region body
PF: predicated region fallthrough
CT: control target
= control target key end

     0   :  { %10 = vsyncpa [#allocation4], 0  ;;  %s1212_s0 = inlined_call_operand.hbm [shape: bf16[16,128], index: 0, kind: input, shape index: {}]   ;;  %s1213_s1 = inlined_call_operand.hbm [shape: bf16[128,256], index: 1, kind: input, shape index: {}]   ;;  %s1214_s2 = inlined_call_operand.vmem [shape: f32[1,256], index: 2, kind: input, shape index: {}]   ;;  %s1215_s3 = inlined_call_operand.hbm [shape: bf16[256,128], index: 3, kind: input, shape index: {}]   ;;  %s1216_s4 = inlined_call_operand.vmem [shape: f32[1,128], index: 4, kind: input, shape index: {}]   ;;  %s1217_s5 = inlined_call_operand.hbm [shape: f32[16,128], index: 5, kind: output, shape index: {}]  }
   0x1   :  { %11 = vsyncpa [#allocation7], 0 }
   0x2   :  { %12 = vsyncpa [#allocation5], 0  ;;  %s1024_s18 = smov 0   ;;  %s1026_s19 = smov 0  }
   0x3   :  { %s1028_s20 = smov 0  }
   0x4 LB: > { %s981_s21 = smov [#allocation6]   ;;  %s647_s23 = sadd.s32 4294967295, %s979_s20   ;;  %s979_s20 = sphi %s1028_s20, %s18_s20   ;;  %s975_s19 = sphi %s1026_s19, %s1230_s19   ;;  %s971_s18 = sphi %s1024_s18, %s1229_s18  }
   0x5   : > { %s204_s22 = sshll.u32 %s981_s21, 4  ;;  %p648_p0 = scmp.ge.s32.totalorder %s979_s20, 1  ;;  %s1048_s22 = int_to_ptr.vmem [resolvable:$true] %s204_s22 }
   0x6   : > { %p176_p1 = scmp.lt.s32.totalorder %s979_s20, 3  ;;  %p1044_p2 = scmp.eq.s32.totalorder %s647_s23, 0 }
   0x7   : > { %s27_s27 = sadd.s32 1, %s975_s19  ;;  %s982_s29 = smov [#allocation3]  }
   0x8   : > { %s1221_s24 = scalar_select %p1044_p2, 1, 0 }
   0x9   : > { %p1050_p3 = pnand %p648_p0, %p176_p1  ;;  %p1063_p6 = scmp.ge.s32.totalorder %s27_s27, 2 }
   0xa   : > { %s191_s30 = sshll.u32 %s982_s29, 4  ;;  %s835_s8 = scalar_lea.hbm %s1213_s1, 2048  ;;  %s192_s30 = int_to_ptr.vmem [resolvable:$true] %s191_s30 }
   0xb   : > { %s1222_s25 = scalar_select %p1050_p3, 1, 0 }
   0xc   : > { %p759_p4 = pneg %p1050_p3  ;;  %p836_p7 = scmp.ne.s32.totalorder %s1213_s1, %s835_s8 }
   0xd   : > { %p842_p11 = scmp.lt.u32.totalorder %s835_s8, %s1213_s1 }
   0xe   : > { %p1058_p5 = pnand %p1044_p2, %p759_p4 }
  0x10   : > { %p1075_p8 = pneg %p1058_p5 }
  0x12   : > { %p838_p9 = pnand %p1075_p8, %p836_p7 }
  0x14   : > { %p839_p10 = pneg %p838_p9 }
  0x16   : > { %p844_p12 = pnand %p842_p11, %p839_p10 }
  0x18   : > { %847 = shalt.err (!%p844_p12)
}
  0x19   : > { %s848_s14 = scalar_lea.vmem %s1048_s22, 2048  ;;  %p856_p4 = scmp.lt.s32.totalorder %s1048_s22, %s1048_s22 }
  0x1a   : > { %p849_p13 = scmp.ne.s32.totalorder %s1048_s22, %s848_s14  ;;  %p857_p2 = scmp.lt.s32.totalorder %s848_s14, %s848_s14 }
  0x1c   : > { %p851_p0 = pnand %p849_p13, %p1075_p8  ;;  %p858_p7 = por %p857_p2, %p856_p4 }
  0x1e   : > { %p852_p1 = pneg %p851_p0 }
  0x20   : > { %p859_p9 = pnand %p858_p7, %p852_p1 }
  0x22   : > { %862 = shalt.err (!%p859_p9)
}
  0x23   : > { %s983_s15 = smov 128   ;;  %s984_s16 = smov 8  }
  0x24   : > { %765 = dma.hbm_to_vmem [thread:$0]  (!%p1058_p5), %s1213_s1, 2048, %s1048_s22, [#allocation7], %s983_s15, %s983_s15, %s984_s16  }
  0x25   : > { %s1232_s27 = smov (%p1063_p6, %s27_s27), 0  ;;  %s863_s7 = scalar_lea.hbm %s1212_s0, 128 }
  0x26   : > { %p864_p2 = scmp.ne.s32.totalorder %s1212_s0, %s863_s7  ;;  %p870_p12 = scmp.lt.u32.totalorder %s863_s7, %s1212_s0 }
  0x28   : > { %p866_p10 = pnand %p864_p2, %p1075_p8 }
  0x2a   : > { %p867_p11 = pneg %p866_p10 }
  0x2c   : > { %p872_p13 = pnand %p870_p12, %p867_p11 }
  0x2e   : > { %875 = shalt.err (!%p872_p13)
}
  0x2f   : > { %s876_s22 = scalar_lea.vmem %s192_s30, 128  ;;  %p884_p4 = scmp.lt.s32.totalorder %s192_s30, %s192_s30 }
  0x30   : > { %p877_p6 = scmp.ne.s32.totalorder %s192_s30, %s876_s22  ;;  %p885_p7 = scmp.lt.s32.totalorder %s876_s22, %s876_s22 }
  0x32   : > { %p879_p0 = pnand %p877_p6, %p1075_p8  ;;  %p886_p9 = por %p885_p7, %p884_p4 }
  0x34   : > { %p880_p1 = pneg %p879_p0 }
  0x36   : > { %p887_p3 = pnand %p886_p9, %p880_p1 }
  0x38   : > { %890 = shalt.err (!%p887_p3)
}
  0x39   : > { %s985_s28 = smov 64   ;;  %s986_s13 = smov 4  }
  0x3a   : > { %762 = dma.hbm_to_vmem [thread:$0]  (!%p1058_p5), %s1212_s0, 128, %s192_s30, [#allocation4], %s985_s28, %s985_s28, %s986_s13  }
  0x3b   : > { %s987_s16 = smov [#allocation8]   ;;  %s891_s6 = scalar_lea.hbm %s1215_s3, 2048 }
  0x3c   : > { %s217_s17 = sshll.u32 %s987_s16, 4  ;;  %p892_p3 = scmp.ne.s32.totalorder %s1215_s3, %s891_s6  ;;  %s218_s17 = int_to_ptr.vmem [resolvable:$true] %s217_s17 }
  0x3d   : > { %p898_p11 = scmp.lt.u32.totalorder %s891_s6, %s1215_s3 }
  0x3e   : > { %p894_p2 = pnand %p892_p3, %p1075_p8 }
  0x40   : > { %p895_p10 = pneg %p894_p2 }
  0x42   : > { %p900_p12 = pnand %p898_p11, %p895_p10 }
  0x44   : > { %903 = shalt.err (!%p900_p12)
}
  0x45   : > { %s904_s30 = scalar_lea.vmem %s218_s17, 2048  ;;  %p912_p1 = scmp.lt.s32.totalorder %s218_s17, %s218_s17 }
  0x46   : > { %p905_p13 = scmp.ne.s32.totalorder %s218_s17, %s904_s30  ;;  %p913_p4 = scmp.lt.s32.totalorder %s904_s30, %s904_s30 }
  0x48   : > { %p907_p6 = pnand %p905_p13, %p1075_p8  ;;  %p914_p7 = por %p913_p4, %p912_p1 }
  0x4a   : > { %p908_p0 = pneg %p907_p6 }
  0x4c   : > { %p915_p9 = pnand %p914_p7, %p908_p0 }
  0x4e   : > { %918 = shalt.err (!%p915_p9)
}
  0x4f   : > { %768 = dma.hbm_to_vmem [thread:$0]  (!%p1058_p5), %s1215_s3, 2048, %s218_s17, [#allocation7], %s985_s28, %s985_s28, %s986_s13  }
  0x50   : > { %p1226_p3 = scmp.ne.s32.totalorder %s1222_s25, 0 }
  0x51   : > { %p1227_p2 = scmp.ne.s32.totalorder (!%p1226_p3), %s1221_s24, 0 }
  0x52   : > { %242 = sbr.rel (%p1226_p3) target bundleno = 626 (0x272), region = 40 }
  0x59   : > { %958 = dma.done.wait (%p1227_p2), [#allocation4], 128  }
  0x5a   : > { %960 = vsyncadd (%p1227_p2), [#allocation4], 4294967168 }
  0x5b   : > { %962 = dma.done.wait (%p1227_p2), [#allocation7], 4096  }
  0x5c   : > { %964 = vsyncadd (%p1227_p2), [#allocation7], 4294963200  ;;  %p272_p8 = scmp.lt.s32.totalorder %s971_s18, 1  ;;  %p657_p5 = scmp.ne.s32.totalorder %s971_s18, 0 }
  0x5d   : > { %v988_v0 = vmov (!%p657_p5), 0.0  }
  0x5e   : > { %s1148_s26 = scalar_select %p272_p8, %s971_s18, 1 }
  0x5f   : > { %280 = sbr.rel (%p657_p5) target bundleno = 102 (0x66), region = 56  ;;  %281 = vst [vmem:[#allocation2] sm:$0xff] (!%p657_p5), %v988_v0  ;;  %282 = vst [vmem:[#allocation2 + $0x8] sm:$0xff] (!%p657_p5), %v988_v0 }
  0x60   : > { %s274_s28 = scalar_lea.vmem %s1214_s2, %s1148_s26 }
  0x66 PF: > { %s658_s24 = sshll.u32 %s971_s18, 7  ;;  %v989_v1 = vmov 0.0   ;;  %vm990_vm0 = vmmov 0   ;;  %v822_v12 = vld [vmem:[#allocation3] sm:$0xff]   ;;  %v661_v19 = vld [vmem:[%s274_s28] ss:$0 sm:$0xff] }
  0x67   : > { %703 = vmatprep.subr.bf16.mxu0 %v989_v1  ;;  %s286_s13 = sshra.s32 %s658_s24, 7  ;;  %719 = vmatprep.mubr.msk.bf16.mxu0 %vm990_vm0, %v989_v1  ;;  %s307_s15 = sshra.s32 %s658_s24, 3  ;;  %v438_v37 = vld [vmem:[#allocation2] sm:$0xff]  ;;  %v439_v39 = vld [vmem:[#allocation2 + $0x8] sm:$0xff] }
  0x68   : > { %s659_s14 = sshll.u32 %s286_s13, 2  ;;  %723 = vmatprep.subr.bf16.mxu1 %v989_v1  ;;  %739 = vmatprep.mubr.msk.bf16.mxu1 %vm990_vm0, %v989_v1  ;;  %s660_s17 = sshll.u32 %s307_s15, 2 }
  0x69   : > { %s289_s16 = scalar_lea.vmem [#allocation6], %s659_s14  ;;  %s1156_s21 = scalar_lea.vmem [#allocation8], %s660_s17 }
  0x6a   : > { %v814_v2 = vld [vmem:[%s289_s16] ss:$8 sps:$4 sm:$0xff]   ;;  %v815_v3 = vld [vmem:[%s289_s16 + $0x10] ss:$8 sps:$4 sm:$0xff]   ;;  %p679_p10 = scmp.ne.s32.totalorder %s971_s18, 1 }
  0x6b   : > { %704 = vmatpush3.bf16.msra.mxu0 %v814_v2  ;;  %v816_v4 = vld [vmem:[%s289_s16 + $0x20] ss:$8 sps:$4 sm:$0xff]   ;;  %v817_v5 = vld [vmem:[%s289_s16 + $0x30] ss:$8 sps:$4 sm:$0xff]  }
  0x6c   : > { %705 = vmatprep.subr.bf16.mxu0 %v989_v1  ;;  %v823_v6 = vld [vmem:[%s1156_s21] sm:$0xff]   ;;  %v824_v7 = vld [vmem:[%s1156_s21 + $0x8] sm:$0xff]   ;;  %v819_v9 = vld [vmem:[%s289_s16 + $0x50] ss:$8 sps:$4 sm:$0xff]  }
  0x6d   : > { %724 = vmatpush3.bf16.msra.mxu1 %v823_v6  ;;  %v818_v8 = vld [vmem:[%s289_s16 + $0x40] ss:$8 sps:$4 sm:$0xff]   ;;  %v821_v11 = vld [vmem:[%s289_s16 + $0x70] ss:$8 sps:$4 sm:$0xff]  }
  0x6e   : > { %725 = vmatprep.subr.bf16.mxu1 %v989_v1  ;;  %v820_v10 = vld [vmem:[%s289_s16 + $0x60] ss:$8 sps:$4 sm:$0xff]   ;;  %v825_v13 = vld [vmem:[%s1156_s21 + $0x10] sm:$0xff]   ;;  %v826_v14 = vld [vmem:[%s1156_s21 + $0x18] sm:$0xff]  }
  0x6f   : > { %706 = vmatpush3.bf16.msra.mxu0 %v815_v3  ;;  %v827_v15 = vld [vmem:[%s1156_s21 + $0x20] sm:$0xff]   ;;  %v828_v16 = vld [vmem:[%s1156_s21 + $0x28] sm:$0xff]   ;;  %v829_v17 = vld [vmem:[%s1156_s21 + $0x30] sm:$0xff]  }
  0x70   : > { %707 = vmatprep.subr.bf16.mxu0 %v989_v1  ;;  %v830_v18 = vld [vmem:[%s1156_s21 + $0x38] sm:$0xff]   ;;  %v680_v46 = vld [vmem:[%s1216_s4] ss:$0 sm:$0xff] (!%p679_p10) }
  0x71   : > { %726 = vmatpush3.bf16.msra.mxu1 %v824_v7 }
  0x72   : > { %727 = vmatprep.subr.bf16.mxu1 %v989_v1 }
  0x73   : > { %708 = vmatpush3.bf16.msra.mxu0 %v816_v4 }
  0x74   : > { %709 = vmatprep.subr.bf16.mxu0 %v989_v1 }
  0x75   : > { %728 = vmatpush3.bf16.msra.mxu1 %v825_v13 }
  0x76   : > { %729 = vmatprep.subr.bf16.mxu1 %v989_v1 }
  0x77   : > { %710 = vmatpush3.bf16.msra.mxu0 %v817_v5 }
  0x78   : > { %711 = vmatprep.subr.bf16.mxu0 %v989_v1 }
  0x79   : > { %730 = vmatpush3.bf16.msra.mxu1 %v826_v14 }
  0x7a   : > { %731 = vmatprep.subr.bf16.mxu1 %v989_v1 }
  0x7b   : > { %712 = vmatpush3.bf16.msra.mxu0 %v818_v8 }
  0x7c   : > { %713 = vmatprep.subr.bf16.mxu0 %v989_v1 }
  0x7d   : > { %732 = vmatpush3.bf16.msra.mxu1 %v827_v15 }
  0x7e   : > { %733 = vmatprep.subr.bf16.mxu1 %v989_v1 }
  0x7f   : > { %714 = vmatpush3.bf16.msra.mxu0 %v819_v9 }
  0x80   : > { %715 = vmatprep.subr.bf16.mxu0 %v989_v1 }
  0x81   : > { %734 = vmatpush3.bf16.msra.mxu1 %v828_v16 }
  0x82   : > { %735 = vmatprep.subr.bf16.mxu1 %v989_v1 }
  0x83   : > { %716 = vmatpush3.bf16.msra.mxu0 %v820_v10 }
  0x84   : > { %717 = vmatprep.subr.bf16.mxu0 %v989_v1 }
  0x85   : > { %736 = vmatpush3.bf16.msra.mxu1 %v829_v17 }
  0x86   : > { %737 = vmatprep.subr.bf16.mxu1 %v989_v1 }
  0x87   : > { %718 = vmatpush3.bf16.msra.mxu0 %v821_v11 }
  0x89   : > { %738 = vmatpush3.bf16.msra.mxu1 %v830_v18 }
  0x8a   : > { %720 = vmatmul.mubr.bf16.vlgmr.msra.gmra.mrb[0].mxu0 %v822_v12 }
 0x15d   : > { %v421_v20 = vpop.f32.mrb[0].mxu0 }
 0x15e   : > { %v422_v21 = vadd.f32 %v661_v19, %v421_v20  ;;  %v721_v22 = vpop.f32.mrb[1].mxu0 }
 0x15f   : > { %v424_v23 = vpop.f32.mrb[2].mxu0 }
 0x160   : > { %v430_v24 = vmul.f32 0.70710677, %v422_v21  ;;  %v425_v25 = vadd.f32 %v661_v19, %v424_v23  ;;  %v722_v26 = vpop.f32.mrb[3].mxu0  ;;  %v428_v31 = vmul.f32 0.5, %v422_v21 }
 0x162   : > { %831 = verf.f32 %v430_v24  ;;  %v431_v27 = vmul.f32 0.70710677, %v425_v25  ;;  %v429_v32 = vmul.f32 0.5, %v425_v25 }
 0x164   : > { %833 = verf.f32 %v431_v27 }
 0x16c   : > { %v832_v28 = vpop.eup %831 }
 0x16d   : > { %v434_v29 = vadd.f32 1.0, %v832_v28 }
 0x16e   : > { %v834_v30 = vpop.eup %833 }
 0x16f   : > { %v435_v33 = vadd.f32 1.0, %v834_v30  ;;  %v436_v34 = vmul.f32 %v434_v29, %v428_v31 }
 0x171   : > { %v437_v35 = vmul.f32 %v435_v33, %v429_v32 }
 0x173   : > { %v440_v36 = vpack.c.bf16 %v437_v35, %v436_v34 }
 0x175   : > { %740 = vmatmul.mubr.bf16.vlgmr.msra.gmra.mrb[0].mxu1 %v440_v36 }
 0x247   : > { %537 = sbr.rel (%p679_p10) target bundleno = 600 (0x258), region = 60 }
 0x248   : > { %v523_v38 = vpop.f32.mrb[0].mxu1 }
 0x249   : > { %v530_v40 = vadd.f32 %v523_v38, %v438_v37  ;;  %v741_v41 = vpop.f32.mrb[1].mxu1 }
 0x24a   : > { %v526_v42 = vpop.f32.mrb[2].mxu1 }
 0x24b   : > { %532 = vst [vmem:[#allocation2] sm:$0xff] %v530_v40  ;;  %v531_v43 = vadd.f32 %v526_v42, %v439_v39  ;;  %v742_v44 = vpop.f32.mrb[3].mxu1 }
 0x24d   : > { %533 = vst [vmem:[#allocation2 + $0x8] sm:$0xff] %v531_v43 }
 0x252   : > { %v538_v45 = vld [vmem:[#allocation2] sm:$0xff] }
 0x253   : > { %v547_v48 = vadd.f32 %v680_v46, %v538_v45 }
 0x254   : > { %v539_v47 = vld [vmem:[#allocation2 + $0x8] sm:$0xff] }
 0x255   : > { %v548_v49 = vadd.f32 %v680_v46, %v539_v47  ;;  %549 = vst [vmem:[#allocation9] sm:$0xff] %v547_v48 }
 0x257   : > { %550 = vst [vmem:[#allocation9 + $0x8] sm:$0xff] %v548_v49 }
 0x258 PF: > { %p1177_p11 = scmp.eq.s32.totalorder %s647_s23, 1  ;;  %s991_s18 = smov [#allocation9]  }
 0x259   : > { %s560_s10 = sshll.u32 %s991_s18, 4  ;;  %s561_s10 = int_to_ptr.vmem [resolvable:$true] %s560_s10 }
 0x25a   : > { %s919_s30 = scalar_lea.vmem %s561_s10, 256  ;;  %p926_p0 = scmp.lt.s32.totalorder %s561_s10, %s561_s10 }
 0x25b   : > { %p920_p12 = scmp.ne.s32.totalorder %s561_s10, %s919_s30  ;;  %p927_p1 = scmp.lt.s32.totalorder %s919_s30, %s919_s30 }
 0x25d   : > { %p921_p13 = pnand %p920_p12, %p1177_p11  ;;  %p928_p4 = por %p927_p1, %p926_p0 }
 0x25f   : > { %p922_p6 = pneg %p921_p13 }
 0x261   : > { %p929_p7 = pnand %p928_p4, %p922_p6 }
 0x263   : > { %932 = shalt.err (!%p929_p7)
}
 0x264   : > { %s933_s23 = scalar_lea.hbm %s1217_s5, 256 }
 0x265   : > { %p934_p9 = scmp.ne.s32.totalorder %s1217_s5, %s933_s23  ;;  %p939_p8 = scmp.lt.u32.totalorder %s933_s23, %s1217_s5 }
 0x267   : > { %p935_p3 = pnand %p934_p9, %p1177_p11 }
 0x269   : > { %p936_p2 = pneg %p935_p3 }
 0x26b   : > { %p941_p5 = pnand %p939_p8, %p936_p2 }
 0x26d   : > { %944 = shalt.err (!%p941_p5)
}
 0x26e   : > { %s992_s24 = smov 128   ;;  %s993_s13 = smov 8  }
 0x26f   : > { %756 = dma.vmem_to_hbm [thread:$0]  (%p1177_p11), %s561_s10, 256, %s1217_s5, [#allocation5], %s992_s24, %s992_s24, %s993_s13  }
 0x270   : > { %966 = dma.done.wait (%p1177_p11), [#allocation5], 256  }
 0x271   : > { %968 = vsyncadd (%p1177_p11), [#allocation5], 4294967040 }
 0x272 PF: > { %s18_s20 = sadd.s32 1, %s979_s20   ;;  %s1229_s18 = smov %s975_s19 }
 0x273   : > { %p15_p10 = scmp.ge.s32.totalorder %s18_s20, 4   ;;  %s1230_s19 = smov %s1232_s27 }
 0x275   :  { %17 = sbr.rel (!%p15_p10) target bundleno = 4 (0x4), region = 92 }
 0x27c   :  { %576 = vsyncpa [#allocation4], 1 }
 0x27d   :  { %578 = vsyncpa [#allocation4 + $0x1], 1 }
 0x27e   :  { %579 = vsyncpa [#allocation7], 1 }
 0x27f   :  { %580 = vsyncpa [#allocation5], 1 }
 0x280   :  { %582 = vsyncpa [#allocation5 + $0x1], 1 }

</bundles_post_ra>
